<compile_context>
chip_gen: v5e
topology: v5e:2x2
jax: 0.10.0
libtpu: 0.0.40
codegen_flags: <defaults>
</compile_context>

<pallas_src>
import jax
import jax.numpy as jnp
from jax import lax
from jax.experimental import pallas as pl
from jax.experimental.pallas import tpu as pltpu


def _round_up(x, m):
    return (x + m - 1) // m * m


def _vmem_capacity_bytes():
    try:
        return int(pltpu.get_tpu_info().vmem_capacity_bytes)
    except Exception:
        return 64 * 1024 * 1024  # conservative default: v7x per-TensorCore VMEM


# ---------------------------------------------------------------------------
# Kernels
# ---------------------------------------------------------------------------
def _resident_kernel(x_ref, wt_ref, b_ref, o_ref):
    # x:(TM,S)  wt:(S,S) resident  b:(1,S)  o:(TM,S)
    out = jnp.dot(x_ref[...], wt_ref[...], preferred_element_type=jnp.float32)
    out = out + b_ref[...].astype(jnp.float32)
    sq_sum = jnp.sum(out * out, axis=1, keepdims=True)    # XLU lane reduce
    inv = lax.rsqrt(sq_sum + 1e-24)                       # EUP; same guard role as +1e-20
    o_ref[...] = (out * inv).astype(o_ref.dtype)


def _stream_f32_kernel(x_ref, wt_ref, b_ref, o_ref):
    # f32 I/O: accumulate directly into the resident output block (block (i,0)).
    k = pl.program_id(1)

    @pl.when(k == 0)
    def _():
        o_ref[...] = jnp.zeros_like(o_ref)

    o_ref[...] += jnp.dot(x_ref[...], wt_ref[...],
                          preferred_element_type=jnp.float32)

    @pl.when(k == pl.num_programs(1) - 1)
    def _():
        out = o_ref[...] + b_ref[...].astype(jnp.float32)
        sq_sum = jnp.sum(out * out, axis=1, keepdims=True)
        inv = lax.rsqrt(sq_sum + 1e-24)
        o_ref[...] = out * inv


def _stream_acc_kernel(x_ref, wt_ref, b_ref, o_ref, acc_ref):
    # Non-f32 I/O: keep an f32 VMEM accumulator across the K axis.
    k = pl.program_id(1)

    @pl.when(k == 0)
    def _():
        acc_ref[...] = jnp.zeros_like(acc_ref)

    acc_ref[...] += jnp.dot(x_ref[...], wt_ref[...],
                            preferred_element_type=jnp.float32)

    @pl.when(k == pl.num_programs(1) - 1)
    def _():
        out = acc_ref[...] + b_ref[...].astype(jnp.float32)
        sq_sum = jnp.sum(out * out, axis=1, keepdims=True)
        inv = lax.rsqrt(sq_sum + 1e-24)
        o_ref[...] = (out * inv).astype(o_ref.dtype)


# ---------------------------------------------------------------------------
# Parameter prep + forward wrapper
# ---------------------------------------------------------------------------
def prepare_params(w, b, param_dtype=None):
    """One-time prep: pre-transpose the nn.Linear weight and zero-pad weight
    and bias to a lane-aligned (multiple-of-128) feature size.
    param_dtype=jnp.bfloat16 halves HBM traffic on the weight stream (matmul
    still accumulates in f32); default keeps the original dtype so the f32
    module semantics are preserved exactly."""
    size = w.shape[0]
    s_pad = _round_up(size, 128)
    dt = w.dtype if param_dtype is None else param_dtype
    wt = jnp.zeros((s_pad, s_pad), dt).at[:size, :size].set(w.T.astype(dt))
    b2 = jnp.zeros((1, s_pad), dt).at[0, :size].set(b.astype(dt))
    return wt, b2


def projnet_forward(x, wt_pad, b_pad, *, size=None):
    """x: (N, size).  wt_pad/b_pad come from prepare_params (padded W^T, bias)."""
    n, s = x.shape
    size = s if size is None else size
    s_pad = wt_pad.shape[0]

    x_item = jnp.dtype(x.dtype).itemsize
    w_item = jnp.dtype(wt_pad.dtype).itemsize
    o_item = x_item

    # Feature dim: pad to lane width only when needed (zero columns keep the
    # matmul and the row-wise L2 norm exact).  Ragged M is handled by the grid.
    x_p = x if s == s_pad else jnp.pad(x, ((0, 0), (0, s_pad - s)))

    # Sublane-native row tile: 8 (f32) / 16 (bf16) / 32 (int8/fp8).
    sub = max(8, 32 // x_item)
    tm = min(256, _round_up(n, sub))
    # Keep >= 2 programs on the parallel M axis when there is enough work
    # (both v7x TensorCores active via dimension_semantics="parallel").
    if pl.cdiv(n, tm) == 1 and n > sub:
        tm = _round_up(pl.cdiv(n, 2), sub)
    grid_m = pl.cdiv(n, tm)

    cap = _vmem_capacity_bytes()
    budget = int(cap * 0.8)          # headroom for compiler-internal scratch

    # --- Path A: W^T fully VMEM-resident (read from HBM exactly once). ------
    resident_bytes = (2 * tm * s_pad * x_item        # x tile, double-buffered
                      + 2 * s_pad * s_pad * w_item   # W^T buffer pair (1 DMA)
                      + 2 * tm * s_pad * o_item      # out tile, double-buffered
                      + 2 * s_pad * w_item)          # bias row
    if resident_bytes <= budget:
        grid = (grid_m,)
        in_specs = [
            pl.BlockSpec((tm, s_pad), lambda i: (i, 0)),      # x
            pl.BlockSpec((s_pad, s_pad), lambda i: (0, 0)),   # W^T resident
            pl.BlockSpec((1, s_pad), lambda i: (0, 0)),       # bias
        ]
        out_specs = pl.BlockSpec((tm, s_pad), lambda i: (i, 0))
        scratch_shapes = []
        kernel = _resident_kernel
        dim_sem = ("parallel",)
        footprint = resident_bytes
        w_stream_mult = 1
    else:
        # --- Path B: stream W^T along a K axis. tk always divides s_pad. ----
        # TODO(synk): for very large s_pad an additional output-column (N)
        # grid axis with a two-sweep normalize would keep tiles O(tm*tn).
        tk = max(t for t in (512, 256, 128) if s_pad % t == 0)
        use_acc = x.dtype != jnp.float32

        def stream_bytes(tm_, tk_):
            f = (2 * tm_ * tk_ * x_item
                 + 2 * tk_ * s_pad * w_item
                 + 2 * tm_ * s_pad * o_item
                 + 2 * s_pad * w_item)
            if use_acc:
                f += tm_ * s_pad * 4
            return f

        while stream_bytes(tm, tk) > budget and tm > sub:
            tm = max(sub, _round_up(tm // 2, sub))
        while stream_bytes(tm, tk) > budget and tk > 128:
            tk //= 2                      # stays a divisor of s_pad
        grid_m = pl.cdiv(n, tm)
        grid = (grid_m, s_pad // tk)
        in_specs = [
            pl.BlockSpec((tm, tk), lambda i, k: (i, k)),       # x tile
            pl.BlockSpec((tk, s_pad), lambda i, k: (k, 0)),    # W^T tile
            pl.BlockSpec((1, s_pad), lambda i, k: (0, 0)),     # bias
        ]
        out_specs = pl.BlockSpec((tm, s_pad), lambda i, k: (i, 0))
        scratch_shapes = ([pltpu.VMEM((tm, s_pad), jnp.float32)]
                          if use_acc else [])
        kernel = _stream_acc_kernel if use_acc else _stream_f32_kernel
        dim_sem = ("parallel", "arbitrary")
        footprint = stream_bytes(tm, tk)
        w_stream_mult = grid_m            # honest: W re-read once per M tile

    vmem_limit = min(int(cap * 0.9),
                     max(32 * 1024 * 1024, int(footprint * 1.25)))

    cost = pl.CostEstimate(
        flops=2 * n * s_pad * s_pad,
        transcendentals=n,                                    # one rsqrt per row
        bytes_accessed=(n * s_pad * (x_item + o_item)
                        + w_stream_mult * s_pad * s_pad * w_item
                        + s_pad * w_item))

    out = pl.pallas_call(
        kernel,
        out_shape=jax.ShapeDtypeStruct((n, s_pad), x.dtype),
        grid_spec=pltpu.PrefetchScalarGridSpec(
            num_scalar_prefetch=0,
            grid=grid,
            in_specs=in_specs,
            out_specs=out_specs,
            scratch_shapes=scratch_shapes,
        ),
        compiler_params=pltpu.CompilerParams(
            dimension_semantics=dim_sem,
            vmem_limit_bytes=vmem_limit),
        cost_estimate=cost,
    )(x_p, wt_pad, b_pad)

    return out[:, :size]


def init_params(key, size):
    # Deterministic init mimicking nn.Linear default (uniform in +-1/sqrt(size)).
    kw, kb = jax.random.split(key)
    bound = 1.0 / (size ** 0.5)
    w = jax.random.uniform(kw, (size, size), jnp.float32, -bound, bound)
    b = jax.random.uniform(kb, (size,), jnp.float32, -bound, bound)
    return w, b


if __name__ == "__main__":
    key = jax.random.PRNGKey(0)
    k_x, k_p = jax.random.split(key)

    batch, size = 8, 32
    x = jax.random.normal(k_x, (batch, size), dtype=jnp.float32)
    w, b = init_params(k_p, size)

    # One-time param prep (pre-transposed, lane-padded W^T + bias).
    wt_pad, b_pad = prepare_params(w, b)

    out = projnet_forward(x, wt_pad, b_pad, size=size)
    out = jax.block_until_ready(out)

    # Pure-JAX reference for correctness.
    ref_lin = x @ w.T + b
    ref = ref_lin / (jnp.sqrt(jnp.sum(ref_lin ** 2, axis=1, keepdims=True)) + 1e-20)
    assert out.shape == (batch, size)
    assert jnp.allclose(out, ref, atol=1e-5, rtol=1e-5), \
        float(jnp.max(jnp.abs(out - ref)))

    print("KERNEL_OK")
</pallas_src>

<mosaic_0001>
module attributes {stable_mosaic.version = 11 : i64} {
  func.func @_resident_kernel(%arg0: i32, %arg1: memref<8x128xf32, #tpu.memory_space<vmem>>, %arg2: memref<128x128xf32, #tpu.memory_space<vmem>>, %arg3: memref<1x128xf32, #tpu.memory_space<vmem>>, %arg4: memref<8x128xf32, #tpu.memory_space<vmem>>) attributes {dimension_semantics = [#tpu.dimension_semantics<parallel>], iteration_bounds = array<i64: 1>, scalar_prefetch = 0 : i64, scratch_operands = 0 : i64, tpu.core_type = #tpu.core_type<tc>, window_params = [{transform_indices = @transform_0, window_bounds = array<i64: 8, 128>}, {pipeline_mode = #tpu.pipeline_mode<synchronous>, transform_indices = @transform_1, window_bounds = array<i64: 128, 128>}, {pipeline_mode = #tpu.pipeline_mode<synchronous>, transform_indices = @transform_2, window_bounds = array<i64: 1, 128>}, {transform_indices = @transform_3, window_bounds = array<i64: 8, 128>}]} {
    %c0 = arith.constant 0 : index
    %c0_0 = arith.constant 0 : index
    %0 = vector.load %arg1[%c0, %c0_0] : memref<8x128xf32, #tpu.memory_space<vmem>>, vector<8x128xf32>
    %c0_1 = arith.constant 0 : index
    %c0_2 = arith.constant 0 : index
    %1 = vector.load %arg2[%c0_1, %c0_2] : memref<128x128xf32, #tpu.memory_space<vmem>>, vector<128x128xf32>
    %cst = arith.constant dense<0.000000e+00> : vector<8x128xf32>
    %2 = tpu.matmul %0, %1, %cst {dimension_numbers = #tpu.dot_dimension_numbers<[1], [0], [0], [1], [0, 0, 1, 1], [], []>} : vector<8x128xf32>, vector<128x128xf32>, vector<8x128xf32> -> vector<8x128xf32>
    %c0_3 = arith.constant 0 : index
    %c0_4 = arith.constant 0 : index
    %3 = vector.load %arg3[%c0_3, %c0_4] : memref<1x128xf32, #tpu.memory_space<vmem>>, vector<1x128xf32>
    %4 = vector.broadcast %3 : vector<1x128xf32> to vector<8x128xf32>
    %5 = arith.addf %2, %4 : vector<8x128xf32>
    %6 = arith.mulf %5, %5 : vector<8x128xf32>
    %cst_5 = arith.constant dense<0.000000e+00> : vector<8xf32>
    %7 = vector.multi_reduction <add>, %6, %cst_5 [1] : vector<8x128xf32> to vector<8xf32>
    %8 = vector.shape_cast %7 : vector<8xf32> to vector<8x1xf32>
    %cst_6 = arith.constant 1.000000e-24 : f32
    %9 = vector.broadcast %cst_6 : f32 to vector<8x1xf32>
    %10 = arith.addf %8, %9 : vector<8x1xf32>
    %11 = math.rsqrt %10 : vector<8x1xf32>
    %12 = vector.broadcast %11 : vector<8x1xf32> to vector<8x128xf32>
    %13 = arith.mulf %5, %12 : vector<8x128xf32>
    %c0_7 = arith.constant 0 : index
    %c0_8 = arith.constant 0 : index
    %14 = vector.load %arg4[%c0_7, %c0_8] : memref<8x128xf32, #tpu.memory_space<vmem>>, vector<8x128xf32>
    tpu.vector_store %arg4[%c0_7, %c0_8], %13 {strides = array<i32>} : memref<8x128xf32, #tpu.memory_space<vmem>>, vector<8x128xf32>,
    return
  }
  func.func @transform_0(%arg0: i32) -> (i32, i32) {
    %c0_i32 = arith.constant 0 : i32
    %c0_i32_0 = arith.constant 0 : i32
    return %arg0, %c0_i32 : i32, i32
  }
  func.func @transform_1(%arg0: i32) -> (i32, i32) {
    %c0_i32 = arith.constant 0 : i32
    %c0_i32_0 = arith.constant 0 : i32
    %c0_i32_1 = arith.constant 0 : i32
    return %c0_i32, %c0_i32_0 : i32, i32
  }
  func.func @transform_2(%arg0: i32) -> (i32, i32) {
    %c0_i32 = arith.constant 0 : i32
    %c0_i32_0 = arith.constant 0 : i32
    %c0_i32_1 = arith.constant 0 : i32
    return %c0_i32, %c0_i32_0 : i32, i32
  }
  func.func @transform_3(%arg0: i32) -> (i32, i32) {
    %c0_i32 = arith.constant 0 : i32
    %c0_i32_0 = arith.constant 0 : i32
    return %arg0, %c0_i32 : i32, i32
  }
}

</mosaic_0001>

<bundles_post_ra>
// kernel: tpu_custom_call.1
= control target key start
LH: loop header
LB: loop body
LE: loop exit
PB: predicated region body
PF: predicated region fallthrough
CT: control target
= control target key end

     0   :  { %8 = vsyncpa [#allocation3], 0  ;;  %s243_s0 = inlined_call_operand.hbm [shape: f32[8,128], index: 0, kind: input, shape index: {}]   ;;  %s244_s1 = inlined_call_operand.hbm [shape: f32[128,128], index: 1, kind: input, shape index: {}]   ;;  %s245_s2 = inlined_call_operand.vmem [shape: f32[1,128], index: 2, kind: input, shape index: {}]   ;;  %s246_s3 = inlined_call_operand.hbm [shape: f32[8,128], index: 3, kind: output, shape index: {}]  }
   0x1   :  { %9 = vsyncpa [#allocation6], 0 }
   0x2   :  { %10 = vsyncpa [#allocation4], 0  ;;  %s16_s14 = sshll.u32 %s243_s0, 4  ;;  %s206_s15 = smov [#allocation2]   ;;  %s17_s14 = int_to_ptr.hbm [resolvable:$true] %s16_s14 }
   0x3   :  { %s18_s16 = sshll.u32 %s206_s15, 4  ;;  %s26_s19 = sshll.u32 %s244_s1, 4  ;;  %s19_s16 = int_to_ptr.vmem [resolvable:$true] %s18_s16  ;;  %s27_s19 = int_to_ptr.hbm [resolvable:$true] %s26_s19 }
   0x4   :  { %21 = dma.hbm_to_vmem [thread:$0]  %s17_s14, 128, %s19_s16, [#allocation3]  }
   0x5   :  { %s207_s20 = smov [#allocation5]   ;;  %s208_s22 = smov 128  }
   0x6   :  { %s28_s21 = sshll.u32 %s207_s20, 4  ;;  %s209_s23 = smov 8   ;;  %s29_s21 = int_to_ptr.vmem [resolvable:$true] %s28_s21 }
   0x7   :  { %34 = dma.hbm_to_vmem [thread:$0]  %s27_s19, 2048, %s29_s21, [#allocation6], %s208_s22, %s208_s22, %s209_s23  }
   0x8   :  { %200 = dma.done.wait [#allocation3], 128  }
   0x9   :  { %201 = vsyncadd [#allocation3], 4294967168 }
   0xa   :  { %202 = dma.done.wait [#allocation6], 2048  }
   0xb   :  { %203 = vsyncadd [#allocation6], 4294965248  ;;  %v61_v0 = vld [vmem:[#allocation5 + $0x78] sm:$0xff]  ;;  %v60_v1 = vld [vmem:[#allocation5 + $0x70] sm:$0xff]  ;;  %s210_s24 = smov [#allocation7]  }
   0xc   :  { %66 = vmatpush.msra.mxu0 %v61_v0  ;;  %v59_v2 = vld [vmem:[#allocation5 + $0x68] sm:$0xff]  ;;  %v58_v3 = vld [vmem:[#allocation5 + $0x60] sm:$0xff]  ;;  %v57_v4 = vld [vmem:[#allocation5 + $0x58] sm:$0xff]  ;;  %s107_s25 = sshll.u32 %s210_s24, 4  ;;  %s108_s25 = int_to_ptr.vmem [resolvable:$true] %s107_s25 }
   0xd   :  { %v56_v5 = vld [vmem:[#allocation5 + $0x50] sm:$0xff]  ;;  %v55_v6 = vld [vmem:[#allocation5 + $0x48] sm:$0xff]  ;;  %v54_v7 = vld [vmem:[#allocation5 + $0x40] sm:$0xff] }
   0xe   :  { %67 = vmatpush.msra.mxu0 %v60_v1  ;;  %v53_v8 = vld [vmem:[#allocation5 + $0x38] sm:$0xff]  ;;  %v52_v9 = vld [vmem:[#allocation5 + $0x30] sm:$0xff]  ;;  %v51_v10 = vld [vmem:[#allocation5 + $0x28] sm:$0xff] }
   0xf   :  { %v50_v11 = vld [vmem:[#allocation5 + $0x20] sm:$0xff]  ;;  %v49_v12 = vld [vmem:[#allocation5 + $0x18] sm:$0xff]  ;;  %v48_v13 = vld [vmem:[#allocation5 + $0x10] sm:$0xff] }
  0x10   :  { %68 = vmatpush.msra.mxu0 %v59_v2  ;;  %v47_v14 = vld [vmem:[#allocation5 + $0x8] sm:$0xff]  ;;  %v46_v15 = vld [vmem:[#allocation5] sm:$0xff]  ;;  %v45_v16 = vld [vmem:[#allocation2] sm:$0xff] }
  0x11   :  { %v125_v17 = vld [vmem:[%s245_s2] ss:$0 sm:$0xff]  ;;  %s109_s2 = sshll.u32 %s246_s3, 4  ;;  %s110_s2 = int_to_ptr.hbm [resolvable:$true] %s109_s2 }
  0x12   :  { %69 = vmatpush.msra.mxu0 %v58_v3 }
  0x14   :  { %70 = vmatpush.msra.mxu0 %v57_v4 }
  0x16   :  { %71 = vmatpush.msra.mxu0 %v56_v5 }
  0x18   :  { %72 = vmatpush.msra.mxu0 %v55_v6 }
  0x1a   :  { %73 = vmatpush.msra.mxu0 %v54_v7 }
  0x1c   :  { %74 = vmatpush.msra.mxu0 %v53_v8 }
  0x1e   :  { %75 = vmatpush.msra.mxu0 %v52_v9 }
  0x20   :  { %76 = vmatpush.msra.mxu0 %v51_v10 }
  0x22   :  { %77 = vmatpush.msra.mxu0 %v50_v11 }
  0x24   :  { %78 = vmatpush.msra.mxu0 %v49_v12 }
  0x26   :  { %79 = vmatpush.msra.mxu0 %v48_v13 }
  0x28   :  { %80 = vmatpush.msra.mxu0 %v47_v14 }
  0x2a   :  { %81 = vmatpush.msra.mxu0 %v46_v15 }
  0x2b   :  { %82 = vmatmul.f32.vlgmr.msra.gmra.mxu0 %v45_v16 }
  0xa8   :  { %v83_v18 = vpop.f32.mrf.mxu0 }
  0xa9   :  { %v84_v19 = vadd.f32 %v125_v17, %v83_v18 }
  0xab   :  { %v86_v20 = vmul.f32 %v84_v19, %v84_v19 }
  0xad   :  { %87 = vadd.xlane.f32.xlu0 %v86_v20 }
 0x120   :  { %v88_v21 = vpop.xlane.xlu0 %87 }
 0x121   :  { %v89_v22 = vadd.f32 1e-24, %v88_v21 }
 0x123   :  { %126 = vrsqrt.f32 %v89_v22  ;;  %vm96_vm1 = vweird.f32 %v89_v22 }
 0x129   :  { %v127_v23 = vpop.eup %126 }
 0x12a   :  { %v91_v24 = vmul.f32 %v127_v23, %v89_v22  ;;  %vm97_vm0 = vweird.f32 %v127_v23 }
 0x12b   :  { %vm98_vm2 = vmor %vm96_vm1, %vm97_vm0 }
 0x12c   :  { %v92_v25 = vmul.f32 %v127_v23, %v91_v24 }
 0x12e   :  { %v93_v26 = vmul.f32 0.5, %v92_v25 }
 0x130   :  { %v94_v27 = vsub.f32 1.5, %v93_v26 }
 0x132   :  { %v95_v28 = vmul.f32 %v127_v23, %v94_v27 }
 0x134   :  { %v99_v29 = vsel %vm98_vm2, %v127_v23, %v95_v28 }
 0x135   :  { %v100_v30 = vmul.f32 %v99_v29, %v84_v19 }
 0x137   :  { %101 = vst [vmem:[#allocation7] sm:$0xff] %v100_v30 }
 0x138   :  { %112 = dma.vmem_to_hbm [thread:$0]  %s108_s25, 128, %s110_s2, [#allocation4]  }
 0x139   :  { %204 = dma.done.wait [#allocation4], 128  }
 0x13a   :  { %205 = vsyncadd [#allocation4], 4294967168 }
 0x13b   :  { %117 = vsyncpa [#allocation3], 1 }
 0x13c   :  { %118 = vsyncpa [#allocation6], 1 }
 0x13d   :  { %119 = vsyncpa [#allocation4], 1 }

</bundles_post_ra>
